<compile_context>
chip_gen: v7x
topology: tpu7x:2x2x1
jax: 0.10.0
libtpu: 0.0.40
codegen_flags: <defaults>
</compile_context>

<pallas_src>
import functools
import math

import jax
import jax.numpy as jnp
from jax.experimental import pallas as pl
from jax.experimental.pallas import tpu as pltpu

LN_EPS = 1e-5
_MIB = 1024 * 1024


def _round_up(x, m):
    return (x + m - 1) // m * m


@functools.lru_cache(maxsize=1)
def _chip_info():
    """Returns (vmem_bytes, tensorcores_per_chip, mxu_contraction_width)."""
    vmem_bytes = 128 * _MIB
    try:
        vmem_bytes = int(pltpu.get_tpu_info().vmem_capacity_bytes)
    except Exception:
        pass
    kind = ""
    try:
        kind = jax.devices()[0].device_kind.lower()
    except Exception:
        pass
    is_v7 = ("v7" in kind) or ("7x" in kind)
    num_tc = 2 if (is_v7 or vmem_bytes <= 64 * _MIB) else 1
    mxu_align = 256 if (is_v7 or "v6" in kind) else 128
    return vmem_bytes, num_tc, mxu_align


def _lane_pad(dim, mxu_align):
    # Always lane-align to 128; on 256x256-MXU chips (v6e/v7x) round dims that
    # already exceed 128 up to 256 so the contraction fills the array.
    if dim > 128 and mxu_align == 256:
        return _round_up(dim, 256)
    return _round_up(dim, 128)


def mlp_kernel(x_ref, w1_ref, ln_ref, w2_ref, b2_ref, o_ref, *, inv_hidden):
    # ---- layer1: bf16 x bf16 on the MXU, f32 accumulation.  x is cast here
    # (no separate host-side pad/cast pass over the activations). ----
    x = x_ref[...].astype(w1_ref.dtype)
    h = jnp.dot(x, w1_ref[...], preferred_element_type=jnp.float32)

    ln = ln_ref[...]                       # (3, hid_p): rows = b1, gamma, beta
    h = h + ln[0:1, :]

    # ---- LayerNorm: single fused stats pass over the real hidden dim.
    # Padded hidden columns of h are exactly 0 (zero-padded W1 cols / b1),
    # so full-width sums equal real-width sums; divide by the real hidden dim.
    s1 = jnp.sum(h, axis=-1, keepdims=True)
    s2 = jnp.sum(h * h, axis=-1, keepdims=True)
    mean = s1 * inv_hidden
    # Clamp: E[h^2] - mean^2 can dip below 0 under f32 cancellation.
    var = jnp.maximum(s2 * inv_hidden - mean * mean, 0.0)
    hn = (h - mean) * jax.lax.rsqrt(var + LN_EPS)
    # gamma/beta are zero-padded -> padded hidden columns are 0 into matmul2.
    a = jnp.maximum(hn * ln[1:2, :] + ln[2:3, :], 0.0)

    # ---- layer2: cast activations to bf16 for the MXU, accumulate in f32 ----
    out = jnp.dot(a.astype(w2_ref.dtype), w2_ref[...],
                  preferred_element_type=jnp.float32) + b2_ref[...]
    o_ref[...] = out.astype(o_ref.dtype)


def prepare_params(params):
    """Pad / pack / bf16-cast the weights ONCE; cache the result across calls."""
    input_dim, hidden_dim = params["w1"].shape
    output_dim = params["w2"].shape[1]
    _, _, mxu_align = _chip_info()
    hid_p = _lane_pad(hidden_dim, mxu_align)
    out_p = _lane_pad(output_dim, mxu_align)

    bf16, f32 = jnp.bfloat16, jnp.float32
    w1_p = jnp.zeros((input_dim, hid_p), bf16).at[:, :hidden_dim].set(
        params["w1"].astype(bf16))
    w2_p = jnp.zeros((hid_p, out_p), bf16).at[:hidden_dim, :output_dim].set(
        params["w2"].astype(bf16))
    # b1 / gamma / beta packed into a single resident (3, hid_p) block.
    ln_p = jnp.zeros((3, hid_p), f32)
    ln_p = ln_p.at[0, :hidden_dim].set(params["b1"].reshape(-1).astype(f32))
    ln_p = ln_p.at[1, :hidden_dim].set(params["ln_g"].reshape(-1).astype(f32))
    ln_p = ln_p.at[2, :hidden_dim].set(params["ln_b"].reshape(-1).astype(f32))
    b2_p = jnp.zeros((1, out_p), f32).at[0, :output_dim].set(
        params["b2"].reshape(-1).astype(f32))
    # TODO(synk): on v7x, optionally store W1/W2 as fp8 with per-tensor scales
    # if the accuracy budget allows (halves resident weight VMEM again).
    padded = {"w1": w1_p, "ln": ln_p, "w2": w2_p, "b2": b2_p}
    dims = (int(input_dim), int(hidden_dim), int(output_dim))
    return jax.device_put(padded), dims


def _pick_tb(B, num_tc):
    if num_tc >= 2:
        # v7x: >= 4 parallel steps when B allows -> 2+ steps per TensorCore so
        # each core still overlaps the x-tile DMA with compute.
        tb = min(256, _round_up(max(-(-B // 4), 1), 8))
    else:
        # v5e/v6e (single TC): one big tile amortizes the ~0.35us/step overhead
        # and fills the MXU rows; tile sweeps plateau around 512.
        tb = min(512, _round_up(B, 8))
    return max(8, min(tb, _round_up(B, 8)))


@functools.partial(jax.jit, static_argnames=("dims", "single_buffer_weights"))
def _mlp_forward_impl(x, padded, *, dims, single_buffer_weights):
    input_dim, hidden_dim, output_dim = dims
    B = x.shape[0]
    assert x.shape[1] == input_dim
    w1_p, ln_p, w2_p, b2_p = padded["w1"], padded["ln"], padded["w2"], padded["b2"]
    hid_p = w1_p.shape[1]
    out_p = w2_p.shape[1]

    vmem_cap, num_tc, _ = _chip_info()
    tb = _pick_tb(B, num_tc)

    # Keep the batch a multiple of 8 sublanes (no-op when B % 8 == 0; fuses
    # under jit otherwise).  Feature padding / bf16 cast of x happens in-kernel.
    B_pad = _round_up(B, 8)
    if B_pad != B:
        x = jnp.pad(x, ((0, B_pad - B), (0, 0)))
    grid = (pl.cdiv(B_pad, tb),)
    out_dtype = x.dtype

    def resident(shape):
        zero = tuple(0 for _ in shape)
        if single_buffer_weights:
            # Constant index_map -> single-buffered (halves resident VMEM).
            return pl.BlockSpec(shape, lambda i, _z=zero: _z,
                                pipeline_mode=pl.Buffered(1))
        return pl.BlockSpec(shape, lambda i, _z=zero: _z)

    # ---- generation-aware VMEM budget ----
    wmult = 1 if single_buffer_weights else 2
    weight_bytes = wmult * (w1_p.nbytes + w2_p.nbytes + ln_p.nbytes + b2_p.nbytes)
    stream_bytes = 2 * (tb * input_dim * x.dtype.itemsize
                        + tb * out_p * jnp.dtype(out_dtype).itemsize)
    scratch_bytes = 6 * tb * hid_p * 4
    if vmem_cap <= 64 * _MIB:
        ceiling = max(vmem_cap - 12 * _MIB, 32 * _MIB)   # v7x: leave headroom
    else:
        ceiling = 100 * _MIB                             # v5e/v6e: 128 MiB phys
    vmem_limit = int(min(max(weight_bytes + stream_bytes + scratch_bytes,
                             16 * _MIB), ceiling))

    flops = 2 * B_pad * (input_dim * hid_p + hid_p * out_p)
    bytes_accessed = (x.size * x.dtype.itemsize
                      + w1_p.nbytes + w2_p.nbytes + ln_p.nbytes + b2_p.nbytes
                      + B_pad * out_p * jnp.dtype(out_dtype).itemsize)
    cost = pl.CostEstimate(flops=flops, transcendentals=B_pad,
                           bytes_accessed=bytes_accessed)

    out_padded = pl.pallas_call(
        functools.partial(mlp_kernel, inv_hidden=1.0 / float(hidden_dim)),
        out_shape=jax.ShapeDtypeStruct((B_pad, out_p), out_dtype),
        grid_spec=pltpu.PrefetchScalarGridSpec(
            num_scalar_prefetch=0,
            grid=grid,
            in_specs=[
                pl.BlockSpec((tb, input_dim), lambda i: (i, 0)),  # x (streams)
                resident((input_dim, hid_p)),                     # W1 (bf16)
                resident((3, hid_p)),                             # b1/gamma/beta
                resident((hid_p, out_p)),                         # W2 (bf16)
                resident((1, out_p)),                             # b2
            ],
            out_specs=pl.BlockSpec((tb, out_p), lambda i: (i, 0)),
        ),
        compiler_params=pltpu.CompilerParams(
            dimension_semantics=("parallel",),
            vmem_limit_bytes=vmem_limit,
        ),
        cost_estimate=cost,
    )(x, w1_p, ln_p, w2_p, b2_p)

    return out_padded[:B, :output_dim]


_SINGLE_BUFFER_WEIGHTS = None  # resolved on first call; falls back if the
                               # installed Pallas rejects pl.Buffered(1).


def mlp_forward(x, padded, dims):
    global _SINGLE_BUFFER_WEIGHTS
    if _SINGLE_BUFFER_WEIGHTS is None:
        try:
            out = _mlp_forward_impl(x, padded, dims=dims,
                                    single_buffer_weights=True)
            jax.block_until_ready(out)
            _SINGLE_BUFFER_WEIGHTS = True
            return out
        except Exception:
            _SINGLE_BUFFER_WEIGHTS = False
    return _mlp_forward_impl(x, padded, dims=dims,
                             single_buffer_weights=_SINGLE_BUFFER_WEIGHTS)


def init_params(key, input_dim, hidden_dim, output_dim):
    """Matches the PyTorch module's init: xavier_uniform_ on linear weights,
       default torch uniform bias init, LayerNorm gamma=1 / beta=0."""
    k1, k2, k3, k4 = jax.random.split(key, 4)

    def xavier(k, fan_in, fan_out):
        bound = math.sqrt(6.0 / (fan_in + fan_out))
        # stored as [in, out] (transpose of torch's [out, in])
        return jax.random.uniform(k, (fan_in, fan_out), jnp.float32, -bound, bound)

    def bias(k, fan_in, n):
        bound = 1.0 / math.sqrt(fan_in)
        return jax.random.uniform(k, (1, n), jnp.float32, -bound, bound)

    return {
        "w1": xavier(k1, input_dim, hidden_dim),
        "b1": bias(k2, input_dim, hidden_dim),
        "ln_g": jnp.ones((1, hidden_dim), jnp.float32),
        "ln_b": jnp.zeros((1, hidden_dim), jnp.float32),
        "w2": xavier(k3, hidden_dim, output_dim),
        "b2": bias(k4, hidden_dim, output_dim),
    }


def mlp_reference(x, params):
    """Pure-JAX reference mirroring the kernel numerics (bf16 matmul inputs,
       f32 accumulation, fused-and-clamped LayerNorm stats)."""
    xb = x.astype(jnp.bfloat16)
    w1 = params["w1"].astype(jnp.bfloat16)
    h = jnp.dot(xb, w1, preferred_element_type=jnp.float32) + params["b1"]
    mean = jnp.mean(h, axis=-1, keepdims=True)
    var = jnp.maximum(jnp.mean(h * h, axis=-1, keepdims=True) - mean * mean, 0.0)
    hn = (h - mean) * jax.lax.rsqrt(var + LN_EPS)
    a = jnp.maximum(hn * params["ln_g"] + params["ln_b"], 0.0)
    w2 = params["w2"].astype(jnp.bfloat16)
    return jnp.dot(a.astype(jnp.bfloat16), w2,
                   preferred_element_type=jnp.float32) + params["b2"]


if __name__ == "__main__":
    # Small shapes consistent with the module's forward: xs is [batch, input_dim].
    batch, input_dim, hidden_dim, output_dim = 8, 32, 64, 16

    key = jax.random.PRNGKey(0)
    kx, kp = jax.random.split(key)
    x = jax.random.normal(kx, (batch, input_dim), jnp.float32)
    params = init_params(kp, input_dim, hidden_dim, output_dim)
    padded, dims = prepare_params(params)   # pad / pack / cast weights once

    out = jax.block_until_ready(mlp_forward(x, padded, dims))
    ref = mlp_reference(x, params)
    assert out.shape == (batch, output_dim)
    assert jnp.allclose(out, ref, atol=1e-2, rtol=1e-2), "mismatch vs reference (small)"

    # Larger batch exercises the multi-step "parallel" batch grid (2 steps on
    # single-TC v5e/v6e at tb=512, 4 steps on v7x at tb=256).
    x2 = jax.random.normal(jax.random.PRNGKey(1), (1024, input_dim), jnp.float32)
    out2 = jax.block_until_ready(mlp_forward(x2, padded, dims))
    ref2 = mlp_reference(x2, params)
    assert out2.shape == (1024, output_dim)
    assert jnp.allclose(out2, ref2, atol=1e-2, rtol=1e-2), "mismatch vs reference (large)"

    print("KERNEL_OK")
</pallas_src>

<mosaic_0001>
module attributes {stable_mosaic.version = 11 : i64} {
  func.func @mlp_kernel(%arg0: i32, %arg1: memref<8x32xf32, #tpu.memory_space<vmem>>, %arg2: memref<32x128xbf16, #tpu.memory_space<vmem>>, %arg3: memref<3x128xf32, #tpu.memory_space<vmem>>, %arg4: memref<128x128xbf16, #tpu.memory_space<vmem>>, %arg5: memref<1x128xf32, #tpu.memory_space<vmem>>, %arg6: memref<8x128xf32, #tpu.memory_space<vmem>>) attributes {dimension_semantics = [#tpu.dimension_semantics<parallel>], iteration_bounds = array<i64: 1>, scalar_prefetch = 0 : i64, scratch_operands = 0 : i64, tpu.core_type = #tpu.core_type<tc>, window_params = [{transform_indices = @transform_0, window_bounds = array<i64: 8, 32>}, {pipeline_mode = #tpu.pipeline_mode<synchronous>, transform_indices = @transform_1, window_bounds = array<i64: 32, 128>}, {pipeline_mode = #tpu.pipeline_mode<synchronous>, transform_indices = @transform_2, window_bounds = array<i64: 3, 128>}, {pipeline_mode = #tpu.pipeline_mode<synchronous>, transform_indices = @transform_3, window_bounds = array<i64: 128, 128>}, {pipeline_mode = #tpu.pipeline_mode<synchronous>, transform_indices = @transform_4, window_bounds = array<i64: 1, 128>}, {transform_indices = @transform_5, window_bounds = array<i64: 8, 128>}]} {
    %c0 = arith.constant 0 : index
    %c0_0 = arith.constant 0 : index
    %0 = vector.load %arg1[%c0, %c0_0] : memref<8x32xf32, #tpu.memory_space<vmem>>, vector<8x32xf32>
    %1 = arith.truncf %0 : vector<8x32xf32> to vector<8x32xbf16>
    %c0_1 = arith.constant 0 : index
    %c0_2 = arith.constant 0 : index
    %2 = vector.load %arg2[%c0_1, %c0_2] : memref<32x128xbf16, #tpu.memory_space<vmem>>, vector<32x128xbf16>
    %cst = arith.constant dense<0.000000e+00> : vector<8x128xf32>
    %3 = tpu.matmul %1, %2, %cst {dimension_numbers = #tpu.dot_dimension_numbers<[1], [0], [0], [1], [0, 0, 1, 1], [], []>} : vector<8x32xbf16>, vector<32x128xbf16>, vector<8x128xf32> -> vector<8x128xf32>
    %c0_3 = arith.constant 0 : index
    %c0_4 = arith.constant 0 : index
    %4 = vector.load %arg3[%c0_3, %c0_4] : memref<3x128xf32, #tpu.memory_space<vmem>>, vector<3x128xf32>
    %5 = vector.extract_strided_slice %4 {offsets = [0, 0], sizes = [1, 128], strides = [1, 1]} : vector<3x128xf32> to vector<1x128xf32>
    %6 = vector.broadcast %5 : vector<1x128xf32> to vector<8x128xf32>
    %7 = arith.addf %3, %6 : vector<8x128xf32>
    %cst_5 = arith.constant dense<0.000000e+00> : vector<8xf32>
    %8 = vector.multi_reduction <add>, %7, %cst_5 [1] : vector<8x128xf32> to vector<8xf32>
    %9 = vector.shape_cast %8 : vector<8xf32> to vector<8x1xf32>
    %10 = arith.mulf %7, %7 : vector<8x128xf32>
    %cst_6 = arith.constant dense<0.000000e+00> : vector<8xf32>
    %11 = vector.multi_reduction <add>, %10, %cst_6 [1] : vector<8x128xf32> to vector<8xf32>
    %12 = vector.shape_cast %11 : vector<8xf32> to vector<8x1xf32>
    %cst_7 = arith.constant 1.562500e-02 : f32
    %13 = vector.broadcast %cst_7 : f32 to vector<8x1xf32>
    %14 = arith.mulf %9, %13 : vector<8x1xf32>
    %cst_8 = arith.constant 1.562500e-02 : f32
    %15 = vector.broadcast %cst_8 : f32 to vector<8x1xf32>
    %16 = arith.mulf %12, %15 : vector<8x1xf32>
    %17 = arith.mulf %14, %14 : vector<8x1xf32>
    %18 = arith.subf %16, %17 : vector<8x1xf32>
    %cst_9 = arith.constant 0.000000e+00 : f32
    %19 = vector.broadcast %cst_9 : f32 to vector<8x1xf32>
    %20 = arith.maximumf %18, %19 : vector<8x1xf32>
    %21 = vector.broadcast %14 : vector<8x1xf32> to vector<8x128xf32>
    %22 = arith.subf %7, %21 : vector<8x128xf32>
    %cst_10 = arith.constant 9.99999974E-6 : f32
    %23 = vector.broadcast %cst_10 : f32 to vector<8x1xf32>
    %24 = arith.addf %20, %23 : vector<8x1xf32>
    %25 = math.rsqrt %24 : vector<8x1xf32>
    %26 = vector.broadcast %25 : vector<8x1xf32> to vector<8x128xf32>
    %27 = arith.mulf %22, %26 : vector<8x128xf32>
    %28 = vector.extract_strided_slice %4 {offsets = [1, 0], sizes = [1, 128], strides = [1, 1]} : vector<3x128xf32> to vector<1x128xf32>
    %29 = vector.broadcast %28 : vector<1x128xf32> to vector<8x128xf32>
    %30 = arith.mulf %27, %29 : vector<8x128xf32>
    %31 = vector.extract_strided_slice %4 {offsets = [2, 0], sizes = [1, 128], strides = [1, 1]} : vector<3x128xf32> to vector<1x128xf32>
    %32 = vector.broadcast %31 : vector<1x128xf32> to vector<8x128xf32>
    %33 = arith.addf %30, %32 : vector<8x128xf32>
    %cst_11 = arith.constant 0.000000e+00 : f32
    %34 = vector.broadcast %cst_11 : f32 to vector<8x128xf32>
    %35 = arith.maximumf %33, %34 : vector<8x128xf32>
    %36 = arith.truncf %35 : vector<8x128xf32> to vector<8x128xbf16>
    %c0_12 = arith.constant 0 : index
    %c0_13 = arith.constant 0 : index
    %37 = vector.load %arg4[%c0_12, %c0_13] : memref<128x128xbf16, #tpu.memory_space<vmem>>, vector<128x128xbf16>
    %cst_14 = arith.constant dense<0.000000e+00> : vector<8x128xf32>
    %38 = tpu.matmul %36, %37, %cst_14 {dimension_numbers = #tpu.dot_dimension_numbers<[1], [0], [0], [1], [0, 0, 1, 1], [], []>} : vector<8x128xbf16>, vector<128x128xbf16>, vector<8x128xf32> -> vector<8x128xf32>
    %c0_15 = arith.constant 0 : index
    %c0_16 = arith.constant 0 : index
    %39 = vector.load %arg5[%c0_15, %c0_16] : memref<1x128xf32, #tpu.memory_space<vmem>>, vector<1x128xf32>
    %40 = vector.broadcast %39 : vector<1x128xf32> to vector<8x128xf32>
    %41 = arith.addf %38, %40 : vector<8x128xf32>
    %c0_17 = arith.constant 0 : index
    %c0_18 = arith.constant 0 : index
    %42 = vector.load %arg6[%c0_17, %c0_18] : memref<8x128xf32, #tpu.memory_space<vmem>>, vector<8x128xf32>
    tpu.vector_store %arg6[%c0_17, %c0_18], %41 {strides = array<i32>} : memref<8x128xf32, #tpu.memory_space<vmem>>, vector<8x128xf32>,
    return
  }
  func.func @transform_0(%arg0: i32) -> (i32, i32) {
    %c0_i32 = arith.constant 0 : i32
    %c0_i32_0 = arith.constant 0 : i32
    return %arg0, %c0_i32 : i32, i32
  }
  func.func @transform_1(%arg0: i32) -> (i32, i32) {
    %c0_i32 = arith.constant 0 : i32
    %c0_i32_0 = arith.constant 0 : i32
    %c0_i32_1 = arith.constant 0 : i32
    return %c0_i32, %c0_i32_0 : i32, i32
  }
  func.func @transform_2(%arg0: i32) -> (i32, i32) {
    %c0_i32 = arith.constant 0 : i32
    %c0_i32_0 = arith.constant 0 : i32
    %c0_i32_1 = arith.constant 0 : i32
    return %c0_i32, %c0_i32_0 : i32, i32
  }
  func.func @transform_3(%arg0: i32) -> (i32, i32) {
    %c0_i32 = arith.constant 0 : i32
    %c0_i32_0 = arith.constant 0 : i32
    %c0_i32_1 = arith.constant 0 : i32
    return %c0_i32, %c0_i32_0 : i32, i32
  }
  func.func @transform_4(%arg0: i32) -> (i32, i32) {
    %c0_i32 = arith.constant 0 : i32
    %c0_i32_0 = arith.constant 0 : i32
    %c0_i32_1 = arith.constant 0 : i32
    return %c0_i32, %c0_i32_0 : i32, i32
  }
  func.func @transform_5(%arg0: i32) -> (i32, i32) {
    %c0_i32 = arith.constant 0 : i32
    %c0_i32_0 = arith.constant 0 : i32
    return %arg0, %c0_i32 : i32, i32
  }
}

module attributes {stable_mosaic.version = 11 : i64} {
  func.func @mlp_kernel(%arg0: i32, %arg1: memref<8x32xf32, #tpu.memory_space<vmem>>, %arg2: memref<32x128xbf16, #tpu.memory_space<vmem>>, %arg3: memref<3x128xf32, #tpu.memory_space<vmem>>, %arg4: memref<128x128xbf16, #tpu.memory_space<vmem>>, %arg5: memref<1x128xf32, #tpu.memory_space<vmem>>, %arg6: memref<8x128xf32, #tpu.memory_space<vmem>>) attributes {dimension_semantics = [#tpu.dimension_semantics<parallel>], iteration_bounds = array<i64: 1>, scalar_prefetch = 0 : i64, scratch_operands = 0 : i64, tpu.core_type = #tpu.core_type<tc>, window_params = [{transform_indices = @transform_0, window_bounds = array<i64: 8, 32>}, {pipeline_mode = #tpu.pipeline_mode<synchronous>, transform_indices = @transform_1, window_bounds = array<i64: 32, 128>}, {pipeline_mode = #tpu.pipeline_mode<synchronous>, transform_indices = @transform_2, window_bounds = array<i64: 3, 128>}, {pipeline_mode = #tpu.pipeline_mode<synchronous>, transform_indices = @transform_3, window_bounds = array<i64: 128, 128>}, {pipeline_mode = #tpu.pipeline_mode<synchronous>, transform_indices = @transform_4, window_bounds = array<i64: 1, 128>}, {transform_indices = @transform_5, window_bounds = array<i64: 8, 128>}]} {
    %c0 = arith.constant 0 : index
    %c0_0 = arith.constant 0 : index
    %0 = vector.load %arg1[%c0, %c0_0] : memref<8x32xf32, #tpu.memory_space<vmem>>, vector<8x32xf32>
    %1 = arith.truncf %0 : vector<8x32xf32> to vector<8x32xbf16>
    %c0_1 = arith.constant 0 : index
    %c0_2 = arith.constant 0 : index
    %2 = vector.load %arg2[%c0_1, %c0_2] : memref<32x128xbf16, #tpu.memory_space<vmem>>, vector<32x128xbf16>
    %cst = arith.constant dense<0.000000e+00> : vector<8x128xf32>
    %3 = tpu.matmul %1, %2, %cst {dimension_numbers = #tpu.dot_dimension_numbers<[1], [0], [0], [1], [0, 0, 1, 1], [], []>} : vector<8x32xbf16>, vector<32x128xbf16>, vector<8x128xf32> -> vector<8x128xf32>
    %c0_3 = arith.constant 0 : index
    %c0_4 = arith.constant 0 : index
    %4 = vector.load %arg3[%c0_3, %c0_4] : memref<3x128xf32, #tpu.memory_space<vmem>>, vector<3x128xf32>
    %5 = vector.extract_strided_slice %4 {offsets = [0, 0], sizes = [1, 128], strides = [1, 1]} : vector<3x128xf32> to vector<1x128xf32>
    %6 = vector.broadcast %5 : vector<1x128xf32> to vector<8x128xf32>
    %7 = arith.addf %3, %6 : vector<8x128xf32>
    %cst_5 = arith.constant dense<0.000000e+00> : vector<8xf32>
    %8 = vector.multi_reduction <add>, %7, %cst_5 [1] : vector<8x128xf32> to vector<8xf32>
    %9 = vector.shape_cast %8 : vector<8xf32> to vector<8x1xf32>
    %10 = arith.mulf %7, %7 : vector<8x128xf32>
    %cst_6 = arith.constant dense<0.000000e+00> : vector<8xf32>
    %11 = vector.multi_reduction <add>, %10, %cst_6 [1] : vector<8x128xf32> to vector<8xf32>
    %12 = vector.shape_cast %11 : vector<8xf32> to vector<8x1xf32>
    %cst_7 = arith.constant 1.562500e-02 : f32
    %13 = vector.broadcast %cst_7 : f32 to vector<8x1xf32>
    %14 = arith.mulf %9, %13 : vector<8x1xf32>
    %cst_8 = arith.constant 1.562500e-02 : f32
    %15 = vector.broadcast %cst_8 : f32 to vector<8x1xf32>
    %16 = arith.mulf %12, %15 : vector<8x1xf32>
    %17 = arith.mulf %14, %14 : vector<8x1xf32>
    %18 = arith.subf %16, %17 : vector<8x1xf32>
    %cst_9 = arith.constant 0.000000e+00 : f32
    %19 = vector.broadcast %cst_9 : f32 to vector<8x1xf32>
    %20 = arith.maximumf %18, %19 : vector<8x1xf32>
    %21 = vector.broadcast %14 : vector<8x1xf32> to vector<8x128xf32>
    %22 = arith.subf %7, %21 : vector<8x128xf32>
    %cst_10 = arith.constant 9.99999974E-6 : f32
    %23 = vector.broadcast %cst_10 : f32 to vector<8x1xf32>
    %24 = arith.addf %20, %23 : vector<8x1xf32>
    %25 = math.rsqrt %24 : vector<8x1xf32>
    %26 = vector.broadcast %25 : vector<8x1xf32> to vector<8x128xf32>
    %27 = arith.mulf %22, %26 : vector<8x128xf32>
    %28 = vector.extract_strided_slice %4 {offsets = [1, 0], sizes = [1, 128], strides = [1, 1]} : vector<3x128xf32> to vector<1x128xf32>
    %29 = vector.broadcast %28 : vector<1x128xf32> to vector<8x128xf32>
    %30 = arith.mulf %27, %29 : vector<8x128xf32>
    %31 = vector.extract_strided_slice %4 {offsets = [2, 0], sizes = [1, 128], strides = [1, 1]} : vector<3x128xf32> to vector<1x128xf32>
    %32 = vector.broadcast %31 : vector<1x128xf32> to vector<8x128xf32>
    %33 = arith.addf %30, %32 : vector<8x128xf32>
    %cst_11 = arith.constant 0.000000e+00 : f32
    %34 = vector.broadcast %cst_11 : f32 to vector<8x128xf32>
    %35 = arith.maximumf %33, %34 : vector<8x128xf32>
    %36 = arith.truncf %35 : vector<8x128xf32> to vector<8x128xbf16>
    %c0_12 = arith.constant 0 : index
    %c0_13 = arith.constant 0 : index
    %37 = vector.load %arg4[%c0_12, %c0_13] : memref<128x128xbf16, #tpu.memory_space<vmem>>, vector<128x128xbf16>
    %cst_14 = arith.constant dense<0.000000e+00> : vector<8x128xf32>
    %38 = tpu.matmul %36, %37, %cst_14 {dimension_numbers = #tpu.dot_dimension_numbers<[1], [0], [0], [1], [0, 0, 1, 1], [], []>} : vector<8x128xbf16>, vector<128x128xbf16>, vector<8x128xf32> -> vector<8x128xf32>
    %c0_15 = arith.constant 0 : index
    %c0_16 = arith.constant 0 : index
    %39 = vector.load %arg5[%c0_15, %c0_16] : memref<1x128xf32, #tpu.memory_space<vmem>>, vector<1x128xf32>
    %40 = vector.broadcast %39 : vector<1x128xf32> to vector<8x128xf32>
    %41 = arith.addf %38, %40 : vector<8x128xf32>
    %c0_17 = arith.constant 0 : index
    %c0_18 = arith.constant 0 : index
    %42 = vector.load %arg6[%c0_17, %c0_18] : memref<8x128xf32, #tpu.memory_space<vmem>>, vector<8x128xf32>
    tpu.vector_store %arg6[%c0_17, %c0_18], %41 {strides = array<i32>} : memref<8x128xf32, #tpu.memory_space<vmem>>, vector<8x128xf32>,
    return
  }
  func.func @transform_0(%arg0: i32) -> (i32, i32) {
    %c0_i32 = arith.constant 0 : i32
    %c0_i32_0 = arith.constant 0 : i32
    return %arg0, %c0_i32 : i32, i32
  }
  func.func @transform_1(%arg0: i32) -> (i32, i32) {
    %c0_i32 = arith.constant 0 : i32
    %c0_i32_0 = arith.constant 0 : i32
    %c0_i32_1 = arith.constant 0 : i32
    return %c0_i32, %c0_i32_0 : i32, i32
  }
  func.func @transform_2(%arg0: i32) -> (i32, i32) {
    %c0_i32 = arith.constant 0 : i32
    %c0_i32_0 = arith.constant 0 : i32
    %c0_i32_1 = arith.constant 0 : i32
    return %c0_i32, %c0_i32_0 : i32, i32
  }
  func.func @transform_3(%arg0: i32) -> (i32, i32) {
    %c0_i32 = arith.constant 0 : i32
    %c0_i32_0 = arith.constant 0 : i32
    %c0_i32_1 = arith.constant 0 : i32
    return %c0_i32, %c0_i32_0 : i32, i32
  }
  func.func @transform_4(%arg0: i32) -> (i32, i32) {
    %c0_i32 = arith.constant 0 : i32
    %c0_i32_0 = arith.constant 0 : i32
    %c0_i32_1 = arith.constant 0 : i32
    return %c0_i32, %c0_i32_0 : i32, i32
  }
  func.func @transform_5(%arg0: i32) -> (i32, i32) {
    %c0_i32 = arith.constant 0 : i32
    %c0_i32_0 = arith.constant 0 : i32
    return %arg0, %c0_i32 : i32, i32
  }
}

</mosaic_0001>

<bundles_post_ra>
// kernel: _mlp_forward_impl.1
= control target key start
LH: loop header
LB: loop body
LE: loop exit
PB: predicated region body
PF: predicated region fallthrough
CT: control target
= control target key end

     0   :  { %10 = vsyncpa [#allocation3], 0  ;;  %s546_s0 = inlined_call_operand.hbm [shape: f32[8,32], index: 0, kind: input, shape index: {}]   ;;  %s547_s1 = inlined_call_operand.hbm [shape: bf16[32,128], index: 1, kind: input, shape index: {}]   ;;  %s548_s2 = inlined_call_operand.vmem [shape: f32[3,128], index: 2, kind: input, shape index: {}]   ;;  %s549_s3 = inlined_call_operand.hbm [shape: bf16[128,128], index: 3, kind: input, shape index: {}]   ;;  %s550_s4 = inlined_call_operand.vmem [shape: f32[1,128], index: 4, kind: input, shape index: {}]   ;;  %s551_s5 = inlined_call_operand.hbm [shape: f32[8,128], index: 5, kind: output, shape index: {}]  }
   0x1   :  { %11 = vsyncpa [#allocation6], 0 }
   0x2   :  { %12 = vsyncpa [#allocation4], 0  ;;  %s448_s18 = smov [#allocation5]   ;;  %s354_s22 = scalar_lea.hbm %s547_s1, 256 }
   0x3   :  { %s28_s19 = sshll.u32 %s448_s18, 4  ;;  %p355_p0 = scmp.ne.s32.totalorder %s547_s1, %s354_s22  ;;  %s29_s19 = int_to_ptr.vmem [resolvable:$true] %s28_s19 }
   0x4   :  { %p358_p1 = scmp.lt.u32.totalorder %s354_s22, %s547_s1 }
   0x6   :  { %p360_p2 = pnand %p358_p1, %p355_p0 }
   0x8   :  { %363 = shalt.err (!%p360_p2)
}
   0x9   :  { %s364_s27 = scalar_lea.vmem %s29_s19, 256  ;;  %p369_p4 = scmp.lt.s32.totalorder %s29_s19, %s29_s19 }
   0xa   :  { %p365_p3 = scmp.ne.s32.totalorder %s29_s19, %s364_s27  ;;  %p370_p5 = scmp.lt.s32.totalorder %s364_s27, %s364_s27 }
   0xc   :  { %p371_p6 = por %p370_p5, %p369_p4 }
   0xe   :  { %p372_p7 = pnand %p371_p6, %p365_p3 }
  0x10   :  { %375 = shalt.err (!%p372_p7)
}
  0x11   :  { %s449_s28 = smov 64   ;;  %s450_s29 = smov 4  }
  0x12   :  { %34 = dma.hbm_to_vmem [thread:$0]  %s547_s1, 256, %s29_s19, [#allocation6], %s449_s28, %s449_s28, %s450_s29  }
  0x13   :  { %s451_s7 = smov [#allocation2]   ;;  %s452_s9 = smov [#allocation7]  }
  0x14   :  { %s19_s8 = sshll.u32 %s451_s7, 4  ;;  %s42_s10 = sshll.u32 %s452_s9, 4  ;;  %s20_s8 = int_to_ptr.vmem [resolvable:$true] %s19_s8  ;;  %s43_s10 = int_to_ptr.vmem [resolvable:$true] %s42_s10 }
  0x15   :  { %s376_s13 = scalar_lea.hbm %s546_s0, 128 }
  0x16   :  { %p377_p8 = scmp.ne.s32.totalorder %s546_s0, %s376_s13  ;;  %p380_p9 = scmp.lt.u32.totalorder %s376_s13, %s546_s0 }
  0x18   :  { %p382_p10 = pnand %p380_p9, %p377_p8 }
  0x1a   :  { %385 = shalt.err (!%p382_p10)
}
  0x1b   :  { %s386_s1 = scalar_lea.vmem %s20_s8, 128  ;;  %p391_p12 = scmp.lt.s32.totalorder %s20_s8, %s20_s8 }
  0x1c   :  { %p387_p11 = scmp.ne.s32.totalorder %s20_s8, %s386_s1  ;;  %p392_p13 = scmp.lt.s32.totalorder %s386_s1, %s386_s1 }
  0x1e   :  { %p393_p0 = por %p392_p13, %p391_p12 }
  0x20   :  { %p394_p1 = pnand %p393_p0, %p387_p11 }
  0x22   :  { %397 = shalt.err (!%p394_p1)
}
  0x23   :  { %22 = dma.hbm_to_vmem [thread:$0]  %s546_s0, 128, %s20_s8, [#allocation3]  }
  0x24   :  { %s398_s22 = scalar_lea.hbm %s549_s3, 1024 }
  0x25   :  { %p399_p2 = scmp.ne.s32.totalorder %s549_s3, %s398_s22  ;;  %p402_p3 = scmp.lt.u32.totalorder %s398_s22, %s549_s3 }
  0x27   :  { %p404_p4 = pnand %p402_p3, %p399_p2 }
  0x29   :  { %407 = shalt.err (!%p404_p4)
}
  0x2a   :  { %s408_s27 = scalar_lea.vmem %s43_s10, 1024  ;;  %p413_p6 = scmp.lt.s32.totalorder %s43_s10, %s43_s10 }
  0x2b   :  { %p409_p5 = scmp.ne.s32.totalorder %s43_s10, %s408_s27  ;;  %p414_p7 = scmp.lt.s32.totalorder %s408_s27, %s408_s27 }
  0x2d   :  { %p415_p8 = por %p414_p7, %p413_p6 }
  0x2f   :  { %p416_p9 = pnand %p415_p8, %p409_p5 }
  0x31   :  { %419 = shalt.err (!%p416_p9)
}
  0x32   :  { %48 = dma.hbm_to_vmem [thread:$0]  %s549_s3, 1024, %s43_s10, [#allocation6], %s449_s28, %s449_s28, %s450_s29  }
  0x33   :  { %442 = dma.done.wait [#allocation3], 128  }
  0x34   :  { %443 = vsyncadd [#allocation3], 4294967168 }
  0x35   :  { %444 = dma.done.wait [#allocation6], 1280  }
  0x36   :  { %445 = vsyncadd [#allocation6], 4294966016  ;;  %v453_v0 = vmov 0.0   ;;  %vm454_vm0 = vmmov 0   ;;  %v342_v1 = vld [vmem:[#allocation5] sm:$0xff]   ;;  %v343_v2 = vld [vmem:[#allocation5 + $0x8] sm:$0xff]   ;;  %v68_v5 = vlaneseq }
  0x37   :  { %306 = vmatprep.subr.bf16.mxu0 %v453_v0  ;;  %310 = vmatprep.mubr.msk.bf16.mxu0 %vm454_vm0, %v453_v0  ;;  %v61_v3 = vld [vmem:[#allocation2] sm:$0xff]  ;;  %vm84_vm1 = vcmask 261120   ;;  %v344_v16 = vld [vmem:[#allocation7] sm:$0xff]   ;;  %v346_v18 = vld [vmem:[#allocation7 + $0x10] sm:$0xff]   ;;  %s455_s6 = smov [#allocation8]  }
  0x38   :  { %314 = vmatprep.subr.bf16.mxu1 %v453_v0  ;;  %330 = vmatprep.mubr.msk.bf16.mxu1 %vm454_vm0, %v453_v0  ;;  %v62_v4 = vpack.c.bf16 %v61_v3, %v61_v3  ;;  %v69_v6 = vshrl.u32 %v68_v5, 7  ;;  %v67_v8 = vld [vmem:[%s548_s2] sm:$0x7]  ;;  %v347_v19 = vld [vmem:[#allocation7 + $0x18] sm:$0xff]   ;;  %v348_v20 = vld [vmem:[#allocation7 + $0x20] sm:$0xff]   ;;  %s272_s7 = sshll.u32 %s455_s6, 4  ;;  %s273_s7 = int_to_ptr.vmem [resolvable:$true] %s272_s7 }
  0x39   :  { %307 = vmatpush3.bf16.msra.mxu0 %v342_v1  ;;  %315 = vmatpush3.bf16.msra.mxu1 %v344_v16  ;;  %v345_v17 = vld [vmem:[#allocation7 + $0x8] sm:$0xff]   ;;  %v350_v22 = vld [vmem:[#allocation7 + $0x30] sm:$0xff]   ;;  %v351_v23 = vld [vmem:[#allocation7 + $0x38] sm:$0xff]   ;;  %s420_s8 = scalar_lea.vmem %s273_s7, 128  ;;  %p425_p11 = scmp.lt.s32.totalorder %s273_s7, %s273_s7 }
  0x3a   :  { %308 = vmatprep.subr.bf16.mxu0 %v453_v0  ;;  %v70_v7 = vsub.s32 0, %v69_v6  ;;  %316 = vmatprep.subr.bf16.mxu1 %v453_v0  ;;  %v349_v21 = vld [vmem:[#allocation7 + $0x28] sm:$0xff]   ;;  %v144_v32 = vsub.s32 1, %v69_v6  ;;  %v149_v33 = vsub.s32 2, %v69_v6  ;;  %p421_p10 = scmp.ne.s32.totalorder %s273_s7, %s420_s8  ;;  %p426_p12 = scmp.lt.s32.totalorder %s420_s8, %s420_s8 }
  0x3b   :  { %v285_v43 = vld [vmem:[%s550_s4] ss:$0 sm:$0xff] }
  0x3c   :  { %v71_v9 = vrot.slane %v67_v8, %v70_v7  ;;  %v145_v34 = vrot.slane %v67_v8, %v144_v32  ;;  %v150_v38 = vrot.slane %v67_v8, %v149_v33  ;;  %p427_p13 = por %p426_p12, %p425_p11 }
  0x3d   :  { %309 = vmatpush3.bf16.msra.mxu0 %v343_v2  ;;  %317 = vmatpush3.bf16.msra.mxu1 %v345_v17 }
  0x3e   :  { %318 = vmatprep.subr.bf16.mxu1 %v453_v0  ;;  %p428_p0 = pnand %p427_p13, %p421_p10 }
  0x40   :  { %311 = vmatmul.mubr.msk.bf16.vlgmr.msra.gmra.mrb[0].mxu0 %vm84_vm1, %v62_v4 }
  0x41   :  { %319 = vmatpush3.bf16.msra.mxu1 %v346_v18 }
  0x42   :  { %320 = vmatprep.subr.bf16.mxu1 %v453_v0 }
  0x45   :  { %321 = vmatpush3.bf16.msra.mxu1 %v347_v19 }
  0x46   :  { %322 = vmatprep.subr.bf16.mxu1 %v453_v0 }
  0x49   :  { %323 = vmatpush3.bf16.msra.mxu1 %v348_v20 }
  0x4a   :  { %324 = vmatprep.subr.bf16.mxu1 %v453_v0 }
  0x4d   :  { %325 = vmatpush3.bf16.msra.mxu1 %v349_v21 }
  0x4e   :  { %326 = vmatprep.subr.bf16.mxu1 %v453_v0 }
  0x51   :  { %327 = vmatpush3.bf16.msra.mxu1 %v350_v22 }
  0x52   :  { %328 = vmatprep.subr.bf16.mxu1 %v453_v0 }
  0x55   :  { %329 = vmatpush3.bf16.msra.mxu1 %v351_v23 }
 0x113   :  { %v122_v10 = vpop.f32.mrb[0].mxu0 }
 0x114   :  { %v123_v11 = vadd.f32 %v122_v10, %v71_v9  ;;  %v312_v12 = vpop.f32.mrb[1].mxu0 }
 0x115   :  { %v125_v13 = vpop.f32.mrb[2].mxu0 }
 0x116   :  { %128 = vadd.xlane.f32.xlu0 %v123_v11  ;;  %v313_v14 = vpop.f32.mrb[3].mxu0  ;;  %v130_v15 = vmul.f32 %v123_v11, %v123_v11 }
 0x11a   :  { %131 = vadd.xlane.f32.xlu0 %v130_v15 }
 0x1a3   :  { %v129_v24 = vpop.xlane.xlu0 %128 }
 0x1a4   :  { %v133_v25 = vmul.f32 0.015625, %v129_v24 }
 0x1a6   :  { %v135_v27 = vmul.f32 %v133_v25, %v133_v25  ;;  %v138_v35 = vsub.f32 %v123_v11, %v133_v25 }
 0x1a7   :  { %v132_v26 = vpop.xlane.xlu0 %131 }
 0x1a8   :  { %v134_v28 = vmul.f32 0.015625, %v132_v26 }
 0x1aa   :  { %v136_v29 = vsub.f32 %v134_v28, %v135_v27 }
 0x1ac   :  { %v137_v30 = vmax.f32 %v136_v29, 0.0 }
 0x1ae   :  { %v139_v31 = vadd.f32 1e-05, %v137_v30 }
 0x1b0   :  { %352 = vrsqrt.f32 %v139_v31 }
 0x1ba   :  { %v353_v36 = vpop.eup %352 }
 0x1bb   :  { %v141_v37 = vmul.f32 %v353_v36, %v138_v35 }
 0x1bd   :  { %v146_v39 = vmul.f32 %v145_v34, %v141_v37 }
 0x1bf   :  { %v151_v40 = vadd.f32 %v150_v38, %v146_v39 }
 0x1c1   :  { %v152_v41 = vmax.f32 %v151_v40, 0.0 }
 0x1c3   :  { %v153_v42 = vpack.c.bf16 %v152_v41, %v152_v41 }
 0x1c5   :  { %331 = vmatmul.mubr.bf16.vlgmr.msra.gmra.mrb[0].mxu1 %v153_v42 }
 0x298   :  { %v259_v44 = vpop.f32.mrb[0].mxu1 }
 0x299   :  { %v260_v45 = vadd.f32 %v285_v43, %v259_v44  ;;  %v332_v46 = vpop.f32.mrb[1].mxu1 }
 0x29a   :  { %v262_v47 = vpop.f32.mrb[2].mxu1 }
 0x29b   :  { %265 = vst [vmem:[#allocation8] sm:$0xff] %v260_v45  ;;  %v333_v48 = vpop.f32.mrb[3].mxu1 }
 0x29c   :  { %431 = shalt.err (!%p428_p0)
}
 0x29d   :  { %s432_s4 = scalar_lea.hbm %s551_s5, 128 }
 0x29e   :  { %p433_p1 = scmp.ne.s32.totalorder %s551_s5, %s432_s4  ;;  %p436_p2 = scmp.lt.u32.totalorder %s432_s4, %s551_s5 }
 0x2a0   :  { %p438_p3 = pnand %p436_p2, %p433_p1 }
 0x2a2   :  { %441 = shalt.err (!%p438_p3)
}
 0x2a3   :  { %275 = dma.vmem_to_hbm [thread:$0]  %s273_s7, 128, %s551_s5, [#allocation4]  }
 0x2a4   :  { %446 = dma.done.wait [#allocation4], 128  }
 0x2a5   :  { %447 = vsyncadd [#allocation4], 4294967168 }
 0x2a6   :  { %279 = vsyncpa [#allocation3], 1 }
 0x2a7   :  { %280 = vsyncpa [#allocation6], 1 }
 0x2a8   :  { %281 = vsyncpa [#allocation4], 1 }

// kernel: _mlp_forward_impl.1
= control target key start
LH: loop header
LB: loop body
LE: loop exit
PB: predicated region body
PF: predicated region fallthrough
CT: control target
= control target key end

     0   :  { %10 = vsyncpa [#allocation3], 0  ;;  %s546_s0 = inlined_call_operand.hbm [shape: f32[8,32], index: 0, kind: input, shape index: {}]   ;;  %s547_s1 = inlined_call_operand.hbm [shape: bf16[32,128], index: 1, kind: input, shape index: {}]   ;;  %s548_s2 = inlined_call_operand.vmem [shape: f32[3,128], index: 2, kind: input, shape index: {}]   ;;  %s549_s3 = inlined_call_operand.hbm [shape: bf16[128,128], index: 3, kind: input, shape index: {}]   ;;  %s550_s4 = inlined_call_operand.vmem [shape: f32[1,128], index: 4, kind: input, shape index: {}]   ;;  %s551_s5 = inlined_call_operand.hbm [shape: f32[8,128], index: 5, kind: output, shape index: {}]  }
   0x1   :  { %11 = vsyncpa [#allocation6], 0 }
   0x2   :  { %12 = vsyncpa [#allocation4], 0  ;;  %s448_s18 = smov [#allocation5]   ;;  %s354_s22 = scalar_lea.hbm %s547_s1, 256 }
   0x3   :  { %s28_s19 = sshll.u32 %s448_s18, 4  ;;  %p355_p0 = scmp.ne.s32.totalorder %s547_s1, %s354_s22  ;;  %s29_s19 = int_to_ptr.vmem [resolvable:$true] %s28_s19 }
   0x4   :  { %p358_p1 = scmp.lt.u32.totalorder %s354_s22, %s547_s1 }
   0x6   :  { %p360_p2 = pnand %p358_p1, %p355_p0 }
   0x8   :  { %363 = shalt.err (!%p360_p2)
}
   0x9   :  { %s364_s27 = scalar_lea.vmem %s29_s19, 256  ;;  %p369_p4 = scmp.lt.s32.totalorder %s29_s19, %s29_s19 }
   0xa   :  { %p365_p3 = scmp.ne.s32.totalorder %s29_s19, %s364_s27  ;;  %p370_p5 = scmp.lt.s32.totalorder %s364_s27, %s364_s27 }
   0xc   :  { %p371_p6 = por %p370_p5, %p369_p4 }
   0xe   :  { %p372_p7 = pnand %p371_p6, %p365_p3 }
  0x10   :  { %375 = shalt.err (!%p372_p7)
}
  0x11   :  { %s449_s28 = smov 64   ;;  %s450_s29 = smov 4  }
  0x12   :  { %34 = dma.hbm_to_vmem [thread:$0]  %s547_s1, 256, %s29_s19, [#allocation6], %s449_s28, %s449_s28, %s450_s29  }
  0x13   :  { %s451_s7 = smov [#allocation2]   ;;  %s452_s9 = smov [#allocation7]  }
  0x14   :  { %s19_s8 = sshll.u32 %s451_s7, 4  ;;  %s42_s10 = sshll.u32 %s452_s9, 4  ;;  %s20_s8 = int_to_ptr.vmem [resolvable:$true] %s19_s8  ;;  %s43_s10 = int_to_ptr.vmem [resolvable:$true] %s42_s10 }
  0x15   :  { %s376_s13 = scalar_lea.hbm %s546_s0, 128 }
  0x16   :  { %p377_p8 = scmp.ne.s32.totalorder %s546_s0, %s376_s13  ;;  %p380_p9 = scmp.lt.u32.totalorder %s376_s13, %s546_s0 }
  0x18   :  { %p382_p10 = pnand %p380_p9, %p377_p8 }
  0x1a   :  { %385 = shalt.err (!%p382_p10)
}
  0x1b   :  { %s386_s1 = scalar_lea.vmem %s20_s8, 128  ;;  %p391_p12 = scmp.lt.s32.totalorder %s20_s8, %s20_s8 }
  0x1c   :  { %p387_p11 = scmp.ne.s32.totalorder %s20_s8, %s386_s1  ;;  %p392_p13 = scmp.lt.s32.totalorder %s386_s1, %s386_s1 }
  0x1e   :  { %p393_p0 = por %p392_p13, %p391_p12 }
  0x20   :  { %p394_p1 = pnand %p393_p0, %p387_p11 }
  0x22   :  { %397 = shalt.err (!%p394_p1)
}
  0x23   :  { %22 = dma.hbm_to_vmem [thread:$0]  %s546_s0, 128, %s20_s8, [#allocation3]  }
  0x24   :  { %s398_s22 = scalar_lea.hbm %s549_s3, 1024 }
  0x25   :  { %p399_p2 = scmp.ne.s32.totalorder %s549_s3, %s398_s22  ;;  %p402_p3 = scmp.lt.u32.totalorder %s398_s22, %s549_s3 }
  0x27   :  { %p404_p4 = pnand %p402_p3, %p399_p2 }
  0x29   :  { %407 = shalt.err (!%p404_p4)
}
  0x2a   :  { %s408_s27 = scalar_lea.vmem %s43_s10, 1024  ;;  %p413_p6 = scmp.lt.s32.totalorder %s43_s10, %s43_s10 }
  0x2b   :  { %p409_p5 = scmp.ne.s32.totalorder %s43_s10, %s408_s27  ;;  %p414_p7 = scmp.lt.s32.totalorder %s408_s27, %s408_s27 }
  0x2d   :  { %p415_p8 = por %p414_p7, %p413_p6 }
  0x2f   :  { %p416_p9 = pnand %p415_p8, %p409_p5 }
  0x31   :  { %419 = shalt.err (!%p416_p9)
}
  0x32   :  { %48 = dma.hbm_to_vmem [thread:$0]  %s549_s3, 1024, %s43_s10, [#allocation6], %s449_s28, %s449_s28, %s450_s29  }
  0x33   :  { %442 = dma.done.wait [#allocation3], 128  }
  0x34   :  { %443 = vsyncadd [#allocation3], 4294967168 }
  0x35   :  { %444 = dma.done.wait [#allocation6], 1280  }
  0x36   :  { %445 = vsyncadd [#allocation6], 4294966016  ;;  %v453_v0 = vmov 0.0   ;;  %vm454_vm0 = vmmov 0   ;;  %v342_v1 = vld [vmem:[#allocation5] sm:$0xff]   ;;  %v343_v2 = vld [vmem:[#allocation5 + $0x8] sm:$0xff]   ;;  %v68_v5 = vlaneseq }
  0x37   :  { %306 = vmatprep.subr.bf16.mxu0 %v453_v0  ;;  %310 = vmatprep.mubr.msk.bf16.mxu0 %vm454_vm0, %v453_v0  ;;  %v61_v3 = vld [vmem:[#allocation2] sm:$0xff]  ;;  %vm84_vm1 = vcmask 261120   ;;  %v344_v16 = vld [vmem:[#allocation7] sm:$0xff]   ;;  %v346_v18 = vld [vmem:[#allocation7 + $0x10] sm:$0xff]   ;;  %s455_s6 = smov [#allocation8]  }
  0x38   :  { %314 = vmatprep.subr.bf16.mxu1 %v453_v0  ;;  %330 = vmatprep.mubr.msk.bf16.mxu1 %vm454_vm0, %v453_v0  ;;  %v62_v4 = vpack.c.bf16 %v61_v3, %v61_v3  ;;  %v69_v6 = vshrl.u32 %v68_v5, 7  ;;  %v67_v8 = vld [vmem:[%s548_s2] sm:$0x7]  ;;  %v347_v19 = vld [vmem:[#allocation7 + $0x18] sm:$0xff]   ;;  %v348_v20 = vld [vmem:[#allocation7 + $0x20] sm:$0xff]   ;;  %s272_s7 = sshll.u32 %s455_s6, 4  ;;  %s273_s7 = int_to_ptr.vmem [resolvable:$true] %s272_s7 }
  0x39   :  { %307 = vmatpush3.bf16.msra.mxu0 %v342_v1  ;;  %315 = vmatpush3.bf16.msra.mxu1 %v344_v16  ;;  %v345_v17 = vld [vmem:[#allocation7 + $0x8] sm:$0xff]   ;;  %v350_v22 = vld [vmem:[#allocation7 + $0x30] sm:$0xff]   ;;  %v351_v23 = vld [vmem:[#allocation7 + $0x38] sm:$0xff]   ;;  %s420_s8 = scalar_lea.vmem %s273_s7, 128  ;;  %p425_p11 = scmp.lt.s32.totalorder %s273_s7, %s273_s7 }
  0x3a   :  { %308 = vmatprep.subr.bf16.mxu0 %v453_v0  ;;  %v70_v7 = vsub.s32 0, %v69_v6  ;;  %316 = vmatprep.subr.bf16.mxu1 %v453_v0  ;;  %v349_v21 = vld [vmem:[#allocation7 + $0x28] sm:$0xff]   ;;  %v144_v32 = vsub.s32 1, %v69_v6  ;;  %v149_v33 = vsub.s32 2, %v69_v6  ;;  %p421_p10 = scmp.ne.s32.totalorder %s273_s7, %s420_s8  ;;  %p426_p12 = scmp.lt.s32.totalorder %s420_s8, %s420_s8 }
  0x3b   :  { %v285_v43 = vld [vmem:[%s550_s4] ss:$0 sm:$0xff] }
  0x3c   :  { %v71_v9 = vrot.slane %v67_v8, %v70_v7  ;;  %v145_v34 = vrot.slane %v67_v8, %v144_v32  ;;  %v150_v38 = vrot.slane %v67_v8, %v149_v33  ;;  %p427_p13 = por %p426_p12, %p425_p11 }
  0x3d   :  { %309 = vmatpush3.bf16.msra.mxu0 %v343_v2  ;;  %317 = vmatpush3.bf16.msra.mxu1 %v345_v17 }
  0x3e   :  { %318 = vmatprep.subr.bf16.mxu1 %v453_v0  ;;  %p428_p0 = pnand %p427_p13, %p421_p10 }
  0x40   :  { %311 = vmatmul.mubr.msk.bf16.vlgmr.msra.gmra.mrb[0].mxu0 %vm84_vm1, %v62_v4 }
  0x41   :  { %319 = vmatpush3.bf16.msra.mxu1 %v346_v18 }
  0x42   :  { %320 = vmatprep.subr.bf16.mxu1 %v453_v0 }
  0x45   :  { %321 = vmatpush3.bf16.msra.mxu1 %v347_v19 }
  0x46   :  { %322 = vmatprep.subr.bf16.mxu1 %v453_v0 }
  0x49   :  { %323 = vmatpush3.bf16.msra.mxu1 %v348_v20 }
  0x4a   :  { %324 = vmatprep.subr.bf16.mxu1 %v453_v0 }
  0x4d   :  { %325 = vmatpush3.bf16.msra.mxu1 %v349_v21 }
  0x4e   :  { %326 = vmatprep.subr.bf16.mxu1 %v453_v0 }
  0x51   :  { %327 = vmatpush3.bf16.msra.mxu1 %v350_v22 }
  0x52   :  { %328 = vmatprep.subr.bf16.mxu1 %v453_v0 }
  0x55   :  { %329 = vmatpush3.bf16.msra.mxu1 %v351_v23 }
 0x113   :  { %v122_v10 = vpop.f32.mrb[0].mxu0 }
 0x114   :  { %v123_v11 = vadd.f32 %v122_v10, %v71_v9  ;;  %v312_v12 = vpop.f32.mrb[1].mxu0 }
 0x115   :  { %v125_v13 = vpop.f32.mrb[2].mxu0 }
 0x116   :  { %128 = vadd.xlane.f32.xlu0 %v123_v11  ;;  %v313_v14 = vpop.f32.mrb[3].mxu0  ;;  %v130_v15 = vmul.f32 %v123_v11, %v123_v11 }
 0x11a   :  { %131 = vadd.xlane.f32.xlu0 %v130_v15 }
 0x1a3   :  { %v129_v24 = vpop.xlane.xlu0 %128 }
 0x1a4   :  { %v133_v25 = vmul.f32 0.015625, %v129_v24 }
 0x1a6   :  { %v135_v27 = vmul.f32 %v133_v25, %v133_v25  ;;  %v138_v35 = vsub.f32 %v123_v11, %v133_v25 }
 0x1a7   :  { %v132_v26 = vpop.xlane.xlu0 %131 }
 0x1a8   :  { %v134_v28 = vmul.f32 0.015625, %v132_v26 }
 0x1aa   :  { %v136_v29 = vsub.f32 %v134_v28, %v135_v27 }
 0x1ac   :  { %v137_v30 = vmax.f32 %v136_v29, 0.0 }
 0x1ae   :  { %v139_v31 = vadd.f32 1e-05, %v137_v30 }
 0x1b0   :  { %352 = vrsqrt.f32 %v139_v31 }
 0x1ba   :  { %v353_v36 = vpop.eup %352 }
 0x1bb   :  { %v141_v37 = vmul.f32 %v353_v36, %v138_v35 }
 0x1bd   :  { %v146_v39 = vmul.f32 %v145_v34, %v141_v37 }
 0x1bf   :  { %v151_v40 = vadd.f32 %v150_v38, %v146_v39 }
 0x1c1   :  { %v152_v41 = vmax.f32 %v151_v40, 0.0 }
 0x1c3   :  { %v153_v42 = vpack.c.bf16 %v152_v41, %v152_v41 }
 0x1c5   :  { %331 = vmatmul.mubr.bf16.vlgmr.msra.gmra.mrb[0].mxu1 %v153_v42 }
 0x298   :  { %v259_v44 = vpop.f32.mrb[0].mxu1 }
 0x299   :  { %v260_v45 = vadd.f32 %v285_v43, %v259_v44  ;;  %v332_v46 = vpop.f32.mrb[1].mxu1 }
 0x29a   :  { %v262_v47 = vpop.f32.mrb[2].mxu1 }
 0x29b   :  { %265 = vst [vmem:[#allocation8] sm:$0xff] %v260_v45  ;;  %v333_v48 = vpop.f32.mrb[3].mxu1 }
 0x29c   :  { %431 = shalt.err (!%p428_p0)
}
 0x29d   :  { %s432_s4 = scalar_lea.hbm %s551_s5, 128 }
 0x29e   :  { %p433_p1 = scmp.ne.s32.totalorder %s551_s5, %s432_s4  ;;  %p436_p2 = scmp.lt.u32.totalorder %s432_s4, %s551_s5 }
 0x2a0   :  { %p438_p3 = pnand %p436_p2, %p433_p1 }
 0x2a2   :  { %441 = shalt.err (!%p438_p3)
}
 0x2a3   :  { %275 = dma.vmem_to_hbm [thread:$0]  %s273_s7, 128, %s551_s5, [#allocation4]  }
 0x2a4   :  { %446 = dma.done.wait [#allocation4], 128  }
 0x2a5   :  { %447 = vsyncadd [#allocation4], 4294967168 }
 0x2a6   :  { %279 = vsyncpa [#allocation3], 1 }
 0x2a7   :  { %280 = vsyncpa [#allocation6], 1 }
 0x2a8   :  { %281 = vsyncpa [#allocation4], 1 }

</bundles_post_ra>
